<compile_context>
chip_gen: v7x
topology: tpu7x:2x2x1
jax: 0.10.0
libtpu: 0.0.40
codegen_flags: <defaults>
</compile_context>

<pallas_src>
import jax
import jax.numpy as jnp
from jax.experimental import pallas as pl
from jax.experimental.pallas import tpu as pltpu

VOCAB = 7          # nn.Embedding(7, 7, padding_idx=0)
EMB_DIM = 7
EPS = 1e-12


def _round_up(n, m):
    return ((n + m - 1) // m) * m


def embeddings_kernel_t(xt_ref, table_t_ref, gamma_ref, beta_ref, ot_ref):
    """Lane-dense kernel: every array is (feature, batch_tile)."""
    xt = xt_ref[...]                                      # (d_in, TB) f32
    tb = xt.shape[1]

    # --- categorical index: trunc-toward-zero cast like torch .int(), then +1 ---
    idx = xt[0:1, :].astype(jnp.int32) + 1                # (1, TB)
    # NOTE: out-of-range indices (outside [0, 6]) yield a zero embedding here,
    # whereas PyTorch nn.Embedding would raise an index error.
    # padding_idx=0 semantics rely on the caller keeping table row 0 at zero.

    # --- tiny-vocab gather on the VPU (exact f32 table values, no MXU bf16 passes) ---
    # table_t is (EMB_DIM, VOCAB); column v is the embedding vector of vocab index v.
    table_t = table_t_ref[...]                            # hoisted single load
    emb_t = jnp.zeros((EMB_DIM, tb), jnp.float32)         # (7, TB)
    for v in range(VOCAB):                                # unrolled at trace time
        mask = (idx == v).astype(jnp.float32)             # (1, TB)
        emb_t = emb_t + mask * table_t[:, v:v + 1]        # (1,TB)*(7,1) -> (7,TB)

    xc_t = xt[1:, :]                                      # (d_in - 1, TB)
    d_out = EMB_DIM + xc_t.shape[0]
    inv_d = 1.0 / d_out

    # --- LayerNorm(d_out, eps=1e-12): stats reduce over the (sublane) feature axis ---
    mean = (jnp.sum(emb_t, axis=0, keepdims=True)
            + jnp.sum(xc_t, axis=0, keepdims=True)) * inv_d          # (1, TB)
    emb_c = emb_t - mean
    xc_c = xc_t - mean
    var = (jnp.sum(emb_c * emb_c, axis=0, keepdims=True)
           + jnp.sum(xc_c * xc_c, axis=0, keepdims=True)) * inv_d    # biased var (PyTorch LN)
    inv = jax.lax.rsqrt(var + EPS)                        # (1, TB)

    gamma = gamma_ref[...]                                # (d_out, 1)
    beta = beta_ref[...]
    # Two sublane-range stores; no concatenated full-width temporary.
    ot_ref[0:EMB_DIM, :] = (emb_c * inv * gamma[0:EMB_DIM]
                            + beta[0:EMB_DIM]).astype(ot_ref.dtype)
    ot_ref[EMB_DIM:, :] = (xc_c * inv * gamma[EMB_DIM:]
                           + beta[EMB_DIM:]).astype(ot_ref.dtype)


def _choose_batch_tile(B, block_b):
    # Batch is the minor (lane) axis of every block, so a tile must be a multiple of
    # 128 lanes unless it covers the whole batch in one block.
    if B < 256:
        return B                                          # single full-batch block
    steps = max(2, pl.cdiv(B, block_b))                   # >= 2 steps ...
    if steps % 2:
        steps += 1                                        # ... and an even count (v7x: 2 TCs)
    return _round_up(pl.cdiv(B, steps), 128)


def embeddings_forward_t(xt, table, gamma, beta, *, block_b=16384, out_dtype=jnp.float32):
    """Lane-dense entry point: xt is (d_in, B) feature-major; returns (d_out, B)."""
    d_in, B = xt.shape
    d_out = d_in + EMB_DIM - 1                            # = d_in + 6

    tb = _choose_batch_tile(B, block_b)
    grid = pl.cdiv(B, tb)                                 # ragged last tile -> Pallas partial block

    table_t = jnp.transpose(table.astype(jnp.float32))    # (EMB_DIM, VOCAB), tiny
    gamma_c = gamma.reshape(d_out, 1).astype(jnp.float32)
    beta_c = beta.reshape(d_out, 1).astype(jnp.float32)

    # Scoped-VMEM estimate: double-buffered x/out tiles + tiny constants.  Only raise
    # the limit for huge user-requested tiles, capped by the device's real capacity.
    vmem_needed = 2 * 4 * tb * (d_in + d_out) + 4 * (VOCAB * EMB_DIM + 2 * d_out)
    vmem_limit = None
    if vmem_needed > 12 * 1024 * 1024:
        try:
            capacity = pltpu.get_tpu_info().vmem_capacity_bytes
        except Exception:
            capacity = 64 << 20                           # smallest across v5e/v6e/v7x
        vmem_limit = min(vmem_needed + (8 << 20), capacity - (16 << 20))

    return pl.pallas_call(
        embeddings_kernel_t,
        out_shape=jax.ShapeDtypeStruct((d_out, B), out_dtype),
        grid_spec=pltpu.PrefetchScalarGridSpec(
            num_scalar_prefetch=0,
            grid=(grid,),
            in_specs=[
                pl.BlockSpec((d_in, tb), lambda i: (0, i)),        # x^T, tiled over batch lanes
                pl.BlockSpec((EMB_DIM, VOCAB), lambda i: (0, 0)),  # embedding table^T
                pl.BlockSpec((d_out, 1), lambda i: (0, 0)),        # LN gamma
                pl.BlockSpec((d_out, 1), lambda i: (0, 0)),        # LN beta
            ],
            out_specs=pl.BlockSpec((d_out, tb), lambda i: (0, i)),
        ),
        compiler_params=pltpu.CompilerParams(
            dimension_semantics=("parallel",),
            vmem_limit_bytes=vmem_limit,
        ),
    )(xt, table_t, gamma_c, beta_c)


def embeddings_forward(x, table, gamma, beta, *, block_b=16384, out_dtype=jnp.float32):
    """Drop-in (batch, feature) interface matching the PyTorch module.

    Pays one XLA transpose on the input and one on the output so the Pallas kernel
    runs lane-dense.  Pipelines that can keep activations feature-major should call
    embeddings_forward_t directly and skip both layout copies.
    """
    yt = embeddings_forward_t(jnp.transpose(x), table, gamma, beta,
                              block_b=block_b, out_dtype=out_dtype)
    return jnp.transpose(yt)


def embeddings_reference(x, table, gamma, beta):
    idx = x[:, 0].astype(jnp.int32) + 1
    emb = table[idx]
    feat = jnp.concatenate([emb, x[:, 1:]], axis=-1)
    mean = jnp.mean(feat, axis=-1, keepdims=True)
    var = jnp.mean((feat - mean) ** 2, axis=-1, keepdims=True)
    return (feat - mean) * jax.lax.rsqrt(var + EPS) * gamma + beta


if __name__ == "__main__":
    key = jax.random.PRNGKey(0)
    k_emb, k_ln, k_cat, k_cont = jax.random.split(key, 4)

    d_in = 16
    d_out = d_in + 6

    # Parameters: embedding weight ~ N(0,1) with padding row 0 zeroed (padding_idx=0);
    # LayerNorm affine parameters perturbed away from (1, 0) so they are exercised.
    table = jax.random.normal(k_emb, (VOCAB, EMB_DIM), dtype=jnp.float32)
    table = table.at[0].set(0.0)                          # padding_idx=0
    g_key, b_key = jax.random.split(k_ln)
    gamma = 1.0 + 0.1 * jax.random.normal(g_key, (d_out,), dtype=jnp.float32)
    beta = 0.1 * jax.random.normal(b_key, (d_out,), dtype=jnp.float32)

    # B=16: single full-batch block; B=50: unaligned full-batch block;
    # B=1000: two grid steps with a ragged (masked) last tile.
    for B in (16, 50, 1000):
        kc, kn = jax.random.split(jax.random.fold_in(k_cat, B))
        # Column 0: integer-valued categorical in [-1, 5] (so idx in [0, 6]);
        # the remaining d_in-1 columns are continuous features.
        cat_col = jax.random.randint(kc, (B, 1), -1, 6).astype(jnp.float32)
        cont = jax.random.normal(kn, (B, d_in - 1), dtype=jnp.float32)
        x = jnp.concatenate([cat_col, cont], axis=-1)

        ref = embeddings_reference(x, table, gamma, beta)

        # Drop-in (batch-major) interface.
        out = jax.block_until_ready(embeddings_forward(x, table, gamma, beta))
        assert out.shape == (B, d_out)
        assert jnp.allclose(out, ref, atol=1e-5, rtol=1e-5)

        # Lane-dense (feature-major) interface: no layout copies at all.
        out_t = jax.block_until_ready(
            embeddings_forward_t(jnp.transpose(x), table, gamma, beta))
        assert out_t.shape == (d_out, B)
        assert jnp.allclose(out_t, jnp.transpose(ref), atol=1e-5, rtol=1e-5)

    print("KERNEL_OK")
</pallas_src>

<mosaic_0001>
module attributes {stable_mosaic.version = 11 : i64} {
  func.func @embeddings_kernel_t(%arg0: i32, %arg1: memref<16x16xf32, #tpu.memory_space<vmem>>, %arg2: memref<7x7xf32, #tpu.memory_space<vmem>>, %arg3: memref<22x1xf32, #tpu.memory_space<vmem>>, %arg4: memref<22x1xf32, #tpu.memory_space<vmem>>, %arg5: memref<22x16xf32, #tpu.memory_space<vmem>>) attributes {dimension_semantics = [#tpu.dimension_semantics<parallel>], iteration_bounds = array<i64: 1>, scalar_prefetch = 0 : i64, scratch_operands = 0 : i64, tpu.core_type = #tpu.core_type<tc>, window_params = [{transform_indices = @transform_0, window_bounds = array<i64: 16, 16>}, {pipeline_mode = #tpu.pipeline_mode<synchronous>, transform_indices = @transform_1, window_bounds = array<i64: 7, 7>}, {pipeline_mode = #tpu.pipeline_mode<synchronous>, transform_indices = @transform_2, window_bounds = array<i64: 22, 1>}, {pipeline_mode = #tpu.pipeline_mode<synchronous>, transform_indices = @transform_3, window_bounds = array<i64: 22, 1>}, {transform_indices = @transform_4, window_bounds = array<i64: 22, 16>}]} {
    %c0 = arith.constant 0 : index
    %c0_0 = arith.constant 0 : index
    %0 = vector.load %arg1[%c0, %c0_0] : memref<16x16xf32, #tpu.memory_space<vmem>>, vector<16x16xf32>
    %1 = vector.extract_strided_slice %0 {offsets = [0, 0], sizes = [1, 16], strides = [1, 1]} : vector<16x16xf32> to vector<1x16xf32>
    %2 = arith.fptosi %1 : vector<1x16xf32> to vector<1x16xi32>
    %c1_i32 = arith.constant 1 : i32
    %3 = vector.broadcast %c1_i32 : i32 to vector<1x16xi32>
    %4 = arith.addi %2, %3 : vector<1x16xi32>
    %c0_1 = arith.constant 0 : index
    %c0_2 = arith.constant 0 : index
    %5 = vector.load %arg2[%c0_1, %c0_2] : memref<7x7xf32, #tpu.memory_space<vmem>>, vector<7x7xf32>
    %cst = arith.constant 0.000000e+00 : f32
    %6 = vector.broadcast %cst : f32 to vector<7x16xf32>
    %c0_i32 = arith.constant 0 : i32
    %7 = vector.broadcast %c0_i32 : i32 to vector<1x16xi32>
    %8 = arith.cmpi eq, %4, %7 : vector<1x16xi32>
    %9 = arith.extui %8 : vector<1x16xi1> to vector<1x16xi32>
    %10 = arith.sitofp %9 : vector<1x16xi32> to vector<1x16xf32>
    %11 = vector.extract_strided_slice %5 {offsets = [0, 0], sizes = [7, 1], strides = [1, 1]} : vector<7x7xf32> to vector<7x1xf32>
    %12 = vector.broadcast %10 : vector<1x16xf32> to vector<7x16xf32>
    %13 = vector.broadcast %11 : vector<7x1xf32> to vector<7x16xf32>
    %14 = arith.mulf %12, %13 : vector<7x16xf32>
    %15 = arith.addf %6, %14 : vector<7x16xf32>
    %c1_i32_3 = arith.constant 1 : i32
    %16 = vector.broadcast %c1_i32_3 : i32 to vector<1x16xi32>
    %17 = arith.cmpi eq, %4, %16 : vector<1x16xi32>
    %18 = arith.extui %17 : vector<1x16xi1> to vector<1x16xi32>
    %19 = arith.sitofp %18 : vector<1x16xi32> to vector<1x16xf32>
    %20 = vector.extract_strided_slice %5 {offsets = [0, 1], sizes = [7, 1], strides = [1, 1]} : vector<7x7xf32> to vector<7x1xf32>
    %21 = vector.broadcast %19 : vector<1x16xf32> to vector<7x16xf32>
    %22 = vector.broadcast %20 : vector<7x1xf32> to vector<7x16xf32>
    %23 = arith.mulf %21, %22 : vector<7x16xf32>
    %24 = arith.addf %15, %23 : vector<7x16xf32>
    %c2_i32 = arith.constant 2 : i32
    %25 = vector.broadcast %c2_i32 : i32 to vector<1x16xi32>
    %26 = arith.cmpi eq, %4, %25 : vector<1x16xi32>
    %27 = arith.extui %26 : vector<1x16xi1> to vector<1x16xi32>
    %28 = arith.sitofp %27 : vector<1x16xi32> to vector<1x16xf32>
    %29 = vector.extract_strided_slice %5 {offsets = [0, 2], sizes = [7, 1], strides = [1, 1]} : vector<7x7xf32> to vector<7x1xf32>
    %30 = vector.broadcast %28 : vector<1x16xf32> to vector<7x16xf32>
    %31 = vector.broadcast %29 : vector<7x1xf32> to vector<7x16xf32>
    %32 = arith.mulf %30, %31 : vector<7x16xf32>
    %33 = arith.addf %24, %32 : vector<7x16xf32>
    %c3_i32 = arith.constant 3 : i32
    %34 = vector.broadcast %c3_i32 : i32 to vector<1x16xi32>
    %35 = arith.cmpi eq, %4, %34 : vector<1x16xi32>
    %36 = arith.extui %35 : vector<1x16xi1> to vector<1x16xi32>
    %37 = arith.sitofp %36 : vector<1x16xi32> to vector<1x16xf32>
    %38 = vector.extract_strided_slice %5 {offsets = [0, 3], sizes = [7, 1], strides = [1, 1]} : vector<7x7xf32> to vector<7x1xf32>
    %39 = vector.broadcast %37 : vector<1x16xf32> to vector<7x16xf32>
    %40 = vector.broadcast %38 : vector<7x1xf32> to vector<7x16xf32>
    %41 = arith.mulf %39, %40 : vector<7x16xf32>
    %42 = arith.addf %33, %41 : vector<7x16xf32>
    %c4_i32 = arith.constant 4 : i32
    %43 = vector.broadcast %c4_i32 : i32 to vector<1x16xi32>
    %44 = arith.cmpi eq, %4, %43 : vector<1x16xi32>
    %45 = arith.extui %44 : vector<1x16xi1> to vector<1x16xi32>
    %46 = arith.sitofp %45 : vector<1x16xi32> to vector<1x16xf32>
    %47 = vector.extract_strided_slice %5 {offsets = [0, 4], sizes = [7, 1], strides = [1, 1]} : vector<7x7xf32> to vector<7x1xf32>
    %48 = vector.broadcast %46 : vector<1x16xf32> to vector<7x16xf32>
    %49 = vector.broadcast %47 : vector<7x1xf32> to vector<7x16xf32>
    %50 = arith.mulf %48, %49 : vector<7x16xf32>
    %51 = arith.addf %42, %50 : vector<7x16xf32>
    %c5_i32 = arith.constant 5 : i32
    %52 = vector.broadcast %c5_i32 : i32 to vector<1x16xi32>
    %53 = arith.cmpi eq, %4, %52 : vector<1x16xi32>
    %54 = arith.extui %53 : vector<1x16xi1> to vector<1x16xi32>
    %55 = arith.sitofp %54 : vector<1x16xi32> to vector<1x16xf32>
    %56 = vector.extract_strided_slice %5 {offsets = [0, 5], sizes = [7, 1], strides = [1, 1]} : vector<7x7xf32> to vector<7x1xf32>
    %57 = vector.broadcast %55 : vector<1x16xf32> to vector<7x16xf32>
    %58 = vector.broadcast %56 : vector<7x1xf32> to vector<7x16xf32>
    %59 = arith.mulf %57, %58 : vector<7x16xf32>
    %60 = arith.addf %51, %59 : vector<7x16xf32>
    %c6_i32 = arith.constant 6 : i32
    %61 = vector.broadcast %c6_i32 : i32 to vector<1x16xi32>
    %62 = arith.cmpi eq, %4, %61 : vector<1x16xi32>
    %63 = arith.extui %62 : vector<1x16xi1> to vector<1x16xi32>
    %64 = arith.sitofp %63 : vector<1x16xi32> to vector<1x16xf32>
    %65 = vector.extract_strided_slice %5 {offsets = [0, 6], sizes = [7, 1], strides = [1, 1]} : vector<7x7xf32> to vector<7x1xf32>
    %66 = vector.broadcast %64 : vector<1x16xf32> to vector<7x16xf32>
    %67 = vector.broadcast %65 : vector<7x1xf32> to vector<7x16xf32>
    %68 = arith.mulf %66, %67 : vector<7x16xf32>
    %69 = arith.addf %60, %68 : vector<7x16xf32>
    %70 = vector.extract_strided_slice %0 {offsets = [1, 0], sizes = [15, 16], strides = [1, 1]} : vector<16x16xf32> to vector<15x16xf32>
    %cst_4 = arith.constant dense<0.000000e+00> : vector<16xf32>
    %71 = vector.multi_reduction <add>, %69, %cst_4 [0] : vector<7x16xf32> to vector<16xf32>
    %72 = vector.shape_cast %71 : vector<16xf32> to vector<1x16xf32>
    %cst_5 = arith.constant dense<0.000000e+00> : vector<16xf32>
    %73 = vector.multi_reduction <add>, %70, %cst_5 [0] : vector<15x16xf32> to vector<16xf32>
    %74 = vector.shape_cast %73 : vector<16xf32> to vector<1x16xf32>
    %75 = arith.addf %72, %74 : vector<1x16xf32>
    %cst_6 = arith.constant 0.0454545468 : f32
    %76 = vector.broadcast %cst_6 : f32 to vector<1x16xf32>
    %77 = arith.mulf %75, %76 : vector<1x16xf32>
    %78 = vector.broadcast %77 : vector<1x16xf32> to vector<7x16xf32>
    %79 = arith.subf %69, %78 : vector<7x16xf32>
    %80 = vector.broadcast %77 : vector<1x16xf32> to vector<15x16xf32>
    %81 = arith.subf %70, %80 : vector<15x16xf32>
    %82 = arith.mulf %79, %79 : vector<7x16xf32>
    %cst_7 = arith.constant dense<0.000000e+00> : vector<16xf32>
    %83 = vector.multi_reduction <add>, %82, %cst_7 [0] : vector<7x16xf32> to vector<16xf32>
    %84 = vector.shape_cast %83 : vector<16xf32> to vector<1x16xf32>
    %85 = arith.mulf %81, %81 : vector<15x16xf32>
    %cst_8 = arith.constant dense<0.000000e+00> : vector<16xf32>
    %86 = vector.multi_reduction <add>, %85, %cst_8 [0] : vector<15x16xf32> to vector<16xf32>
    %87 = vector.shape_cast %86 : vector<16xf32> to vector<1x16xf32>
    %88 = arith.addf %84, %87 : vector<1x16xf32>
    %cst_9 = arith.constant 0.0454545468 : f32
    %89 = vector.broadcast %cst_9 : f32 to vector<1x16xf32>
    %90 = arith.mulf %88, %89 : vector<1x16xf32>
    %cst_10 = arith.constant 9.99999996E-13 : f32
    %91 = vector.broadcast %cst_10 : f32 to vector<1x16xf32>
    %92 = arith.addf %90, %91 : vector<1x16xf32>
    %93 = math.rsqrt %92 : vector<1x16xf32>
    %c0_11 = arith.constant 0 : index
    %c0_12 = arith.constant 0 : index
    %94 = vector.load %arg3[%c0_11, %c0_12] : memref<22x1xf32, #tpu.memory_space<vmem>>, vector<22x1xf32>
    %c0_13 = arith.constant 0 : index
    %c0_14 = arith.constant 0 : index
    %95 = vector.load %arg4[%c0_13, %c0_14] : memref<22x1xf32, #tpu.memory_space<vmem>>, vector<22x1xf32>
    %96 = vector.broadcast %93 : vector<1x16xf32> to vector<7x16xf32>
    %97 = arith.mulf %79, %96 : vector<7x16xf32>
    %98 = vector.extract_strided_slice %94 {offsets = [0, 0], sizes = [7, 1], strides = [1, 1]} : vector<22x1xf32> to vector<7x1xf32>
    %99 = vector.broadcast %98 : vector<7x1xf32> to vector<7x16xf32>
    %100 = arith.mulf %97, %99 : vector<7x16xf32>
    %101 = vector.extract_strided_slice %95 {offsets = [0, 0], sizes = [7, 1], strides = [1, 1]} : vector<22x1xf32> to vector<7x1xf32>
    %102 = vector.broadcast %101 : vector<7x1xf32> to vector<7x16xf32>
    %103 = arith.addf %100, %102 : vector<7x16xf32>
    %c0_15 = arith.constant 0 : index
    %c0_16 = arith.constant 0 : index
    %104 = vector.load %arg5[%c0_15, %c0_16] : memref<22x16xf32, #tpu.memory_space<vmem>>, vector<7x16xf32>
    tpu.vector_store %arg5[%c0_15, %c0_16], %103 {strides = array<i32>} : memref<22x16xf32, #tpu.memory_space<vmem>>, vector<7x16xf32>,
    %105 = vector.broadcast %93 : vector<1x16xf32> to vector<15x16xf32>
    %106 = arith.mulf %81, %105 : vector<15x16xf32>
    %107 = vector.extract_strided_slice %94 {offsets = [7, 0], sizes = [15, 1], strides = [1, 1]} : vector<22x1xf32> to vector<15x1xf32>
    %108 = vector.broadcast %107 : vector<15x1xf32> to vector<15x16xf32>
    %109 = arith.mulf %106, %108 : vector<15x16xf32>
    %110 = vector.extract_strided_slice %95 {offsets = [7, 0], sizes = [15, 1], strides = [1, 1]} : vector<22x1xf32> to vector<15x1xf32>
    %111 = vector.broadcast %110 : vector<15x1xf32> to vector<15x16xf32>
    %112 = arith.addf %109, %111 : vector<15x16xf32>
    %c7 = arith.constant 7 : index
    %c0_17 = arith.constant 0 : index
    %113 = vector.load %arg5[%c7, %c0_17] : memref<22x16xf32, #tpu.memory_space<vmem>>, vector<15x16xf32>
    tpu.vector_store %arg5[%c7, %c0_17], %112 {strides = array<i32>} : memref<22x16xf32, #tpu.memory_space<vmem>>, vector<15x16xf32>,
    return
  }
  func.func @transform_0(%arg0: i32) -> (i32, i32) {
    %c0_i32 = arith.constant 0 : i32
    %c0_i32_0 = arith.constant 0 : i32
    return %c0_i32, %arg0 : i32, i32
  }
  func.func @transform_1(%arg0: i32) -> (i32, i32) {
    %c0_i32 = arith.constant 0 : i32
    %c0_i32_0 = arith.constant 0 : i32
    %c0_i32_1 = arith.constant 0 : i32
    return %c0_i32, %c0_i32_0 : i32, i32
  }
  func.func @transform_2(%arg0: i32) -> (i32, i32) {
    %c0_i32 = arith.constant 0 : i32
    %c0_i32_0 = arith.constant 0 : i32
    %c0_i32_1 = arith.constant 0 : i32
    return %c0_i32, %c0_i32_0 : i32, i32
  }
  func.func @transform_3(%arg0: i32) -> (i32, i32) {
    %c0_i32 = arith.constant 0 : i32
    %c0_i32_0 = arith.constant 0 : i32
    %c0_i32_1 = arith.constant 0 : i32
    return %c0_i32, %c0_i32_0 : i32, i32
  }
  func.func @transform_4(%arg0: i32) -> (i32, i32) {
    %c0_i32 = arith.constant 0 : i32
    %c0_i32_0 = arith.constant 0 : i32
    return %c0_i32, %arg0 : i32, i32
  }
}

</mosaic_0001>

<bundles_post_ra>
// kernel: tpu_custom_call.1
= control target key start
LH: loop header
LB: loop body
LE: loop exit
PB: predicated region body
PF: predicated region fallthrough
CT: control target
= control target key end

     0   :  { %v267_v0 = vmov 2   ;;  %v268_v1 = vmov 0   ;;  %v269_v3 = vmov 3   ;;  %v270_v4 = vmov 1   ;;  %s359_s1 = inlined_call_operand.vmem [shape: f32[7,7], index: 1, kind: input, shape index: {}]   ;;  %s360_s2 = inlined_call_operand.vmem [shape: f32[22,1], index: 2, kind: input, shape index: {}]   ;;  %s361_s3 = inlined_call_operand.vmem [shape: f32[22,1], index: 3, kind: input, shape index: {}]   ;;  %s362_s0 = inlined_call_operand.vmem [shape: f32[16,16], index: 0, kind: input, shape index: {}]   ;;  %s363_s4 = inlined_call_operand.vmem [shape: f32[22,16], index: 4, kind: output, shape index: {}]  }
   0x1   :  { %258 = vset.pattern.permute.xlu1 %v267_v0  ;;  %256 = vset.pattern.permute.xlu0 %v268_v1  ;;  %v21_v2 = vld [vmem:[%s359_s1] sm:$0x7f]  ;;  %v271_v5 = vmov 4   ;;  %v272_v6 = vmov 5   ;;  %v176_v7 = vld [vmem:[%s360_s2 + $0x8] sm:$0xff]  ;;  %v273_v8 = vmov 6   ;;  %v25_v17 = vlaneseq }
   0x2   :  { %57 = vperm.xlu1 %258, %v21_v2   ;;  %31 = vperm.xlu0 %256, %v21_v2   ;;  %v179_v9 = vld [vmem:[%s361_s3 + $0x8] sm:$0xff]  ;;  %v175_v10 = vld [vmem:[%s360_s2] sm:$0xff]  ;;  %v177_v11 = vld [vmem:[%s360_s2 + $0x10] sm:$0x3f]  ;;  %vm124_vm2 = vcmask 1046528   ;;  %v274_v24 = vmov 0.0  }
   0x3   :  { %v178_v12 = vld [vmem:[%s361_s3] sm:$0xff]  ;;  %v180_v13 = vld [vmem:[%s361_s3 + $0x10] sm:$0x3f]  ;;  %v330_v19 = vld [vmem:[%s362_s0 + $0x8] sm:$0xff]  ;;  %v26_v20 = vshrl.u32 %v25_v17, 7  ;;  %vm114_vm4 = vcmask 129024  }
   0x4   :  { %v324_v14 = vld [vmem:[%s362_s0] sm:$0xff]  ;;  %v126_v22 = vrot.slane %v330_v19, 1  ;;  %vm130_vm5 = vcmask 130048   ;;  %vm205_vm10 = vcmask 1041408   ;;  %vm232_vm11 = vcmask 130049  }
   0x5   :  { %v246_v15 = vtrunc.f32 %v324_v14  ;;  %v125_v21 = vrot.slane %v324_v14, 1  ;;  %v27_v23 = vsub.s32 0, %v26_v20 }
   0x6   :  { %259 = vset.pattern.permute.xlu1 %v269_v3  ;;  %257 = vset.pattern.permute.xlu0 %v270_v4  ;;  %v132_v34 = vsel %vm114_vm4, %v126_v22, 0.0 }
   0x7   :  { %70 = vperm.xlu1 %259, %v21_v2   ;;  %44 = vperm.xlu0 %257, %v21_v2   ;;  %v247_v16 = vcvt.f32.s32 %v246_v15  ;;  %v127_v27 = vsel %vm124_vm2, %v125_v21, %v126_v22 }
   0x8   :  { %v131_v33 = vsel %vm130_vm5, %v127_v27, 0.0 }
   0x9   :  { %v20_v18 = vadd.s32 1, %v247_v16  ;;  %v133_v41 = vadd.f32 %v132_v34, %v131_v33 }
   0xb   :  { %260 = vset.pattern.permute.xlu1 %v271_v5  ;;  %261 = vset.pattern.permute.xlu0 %v272_v6  ;;  %vm22_vm0 = vcmp.eq.s32.totalorder %v20_v18, 0  ;;  %vm36_vm1 = vcmp.eq.s32.totalorder %v20_v18, 1  ;;  %vm49_vm3 = vcmp.eq.s32.totalorder %v20_v18, 2  ;;  %vm62_vm6 = vcmp.eq.s32.totalorder %v20_v18, 3 }
   0xc   :  { %83 = vperm.xlu1 %260, %v21_v2   ;;  %96 = vperm.xlu0 %261, %v21_v2   ;;  %v239_v25 = vsel %vm22_vm0, 1.0, %v274_v24  ;;  %v240_v26 = vsel %vm36_vm1, 1.0, %v274_v24  ;;  %v241_v30 = vsel %vm49_vm3, 1.0, %v274_v24  ;;  %vm75_vm7 = vcmp.eq.s32.totalorder %v20_v18, 4 }
   0xd   :  { %v28_v31 = vrot.slane %v239_v25, %v27_v23  ;;  %v42_v32 = vrot.slane %v240_v26, %v27_v23  ;;  %vm88_vm8 = vcmp.eq.s32.totalorder %v20_v18, 5  ;;  %v242_v35 = vsel %vm62_vm6, 1.0, %v274_v24 }
   0xe   :  { %v55_v36 = vrot.slane %v241_v30, %v27_v23  ;;  %v243_v37 = vsel %vm75_vm7, 1.0, %v274_v24  ;;  %v244_v40 = vsel %vm88_vm8, 1.0, %v274_v24  ;;  %v68_v43 = vrot.slane %v242_v35, %v27_v23 }
   0xf   :  { %vm101_vm9 = vcmp.eq.s32.totalorder %v20_v18, 6  ;;  %v81_v45 = vrot.slane %v243_v37, %v27_v23  ;;  %v94_v48 = vrot.slane %v244_v40, %v27_v23  ;;  %v134_v50 = vrot.slane %v133_v41, 4 }
  0x10   :  { %262 = vset.pattern.permute.xlu1 %v273_v8  ;;  %264 = vset.pattern.permute.xlu0 %v268_v1  ;;  %v245_v49 = vsel %vm101_vm9, 1.0, %v274_v24 }
  0x11   :  { %109 = vperm.xlu1 %262, %v21_v2   ;;  %199 = vperm.xlu0 %264, %v176_v7   ;;  %v107_v58 = vrot.slane %v245_v49, %v27_v23  ;;  %v135_v59 = vadd.f32 %v134_v50, %v133_v41 }
  0x13   :  { %v136_v0 = vrot.slane %v135_v59, 2 }
  0x15   :  { %263 = vset.pattern.permute.xlu1 %v268_v1  ;;  %217 = vperm.xlu0 %264, %v179_v9   ;;  %v137_v4 = vadd.f32 %v136_v0, %v135_v59 }
  0x16   :  { %184 = vperm.xlu1 %263, %v175_v10  }
  0x17   :  { %v138_v7 = vrot.slane %v137_v4, 1 }
  0x19   :  { %v139_v10 = vadd.f32 %v138_v7, %v137_v4 }
  0x1a   :  { %203 = vperm.xlu1 %263, %v177_v11  }
  0x1e   :  { %190 = vperm.xlu1 %263, %v178_v12  }
  0x22   :  { %221 = vperm.xlu1 %263, %v180_v13  }
  0x81   :  { %v58_v28 = vpop.permute.xlu1 %57  ;;  %v32_v29 = vpop.permute.xlu0 %31 }
  0x82   :  { %v34_v42 = vmul.f32 %v32_v29, %v28_v31  ;;  %v60_v46 = vmul.f32 %v58_v28, %v55_v36 }
  0x86   :  { %v71_v38 = vpop.permute.xlu1 %70  ;;  %v45_v39 = vpop.permute.xlu0 %44 }
  0x87   :  { %v47_v44 = vmul.f32 %v45_v39, %v42_v32  ;;  %v73_v51 = vmul.f32 %v71_v38, %v68_v43 }
  0x89   :  { %v48_v47 = vadd.f32 %v47_v44, %v34_v42 }
  0x8b   :  { %v61_v52 = vadd.f32 %v60_v46, %v48_v47  ;;  %v84_v53 = vpop.permute.xlu1 %83  ;;  %v97_v54 = vpop.permute.xlu0 %96 }
  0x8c   :  { %v86_v55 = vmul.f32 %v84_v53, %v81_v45  ;;  %v99_v57 = vmul.f32 %v97_v54, %v94_v48 }
  0x8d   :  { %v74_v56 = vadd.f32 %v73_v51, %v61_v52 }
  0x8f   :  { %v87_v60 = vadd.f32 %v86_v55, %v74_v56 }
  0x90   :  { %v110_v61 = vpop.permute.xlu1 %109  ;;  %v200_v45 = vpop.permute.xlu0 %199 }
  0x91   :  { %v100_v62 = vadd.f32 %v99_v57, %v87_v60  ;;  %v112_v63 = vmul.f32 %v110_v61, %v107_v58  ;;  %v207_v50 = vrot.slane %v200_v45, 6 }
  0x93   :  { %v113_v1 = vadd.f32 %v112_v63, %v100_v62 }
  0x94   :  { %v218_v47 = vpop.permute.xlu0 %217 }
  0x95   :  { %v115_v2 = vsel %vm114_vm4, %v113_v1, 0.0  ;;  %v185_v36 = vpop.permute.xlu1 %184  ;;  %v224_v54 = vrot.slane %v218_v47, 6 }
  0x96   :  { %v116_v3 = vrot.slane %v115_v2, 4  ;;  %v206_v48 = vrot.slane %v185_v36, 6 }
  0x98   :  { %v117_v5 = vadd.f32 %v116_v3, %v115_v2  ;;  %v208_v58 = vsel %vm205_vm10, %v206_v48, %v207_v50 }
  0x99   :  { %v204_v41 = vpop.permute.xlu1 %203 }
  0x9a   :  { %v118_v6 = vrot.slane %v117_v5, 2  ;;  %v209_v49 = vrot.slane %v204_v41, 6 }
  0x9c   :  { %v119_v8 = vadd.f32 %v118_v6, %v117_v5  ;;  %v210_v59 = vsel %vm205_vm10, %v207_v50, %v209_v49 }
  0x9d   :  { %v191_v44 = vpop.permute.xlu1 %190 }
  0x9e   :  { %v120_v9 = vrot.slane %v119_v8, 1  ;;  %v223_v52 = vrot.slane %v191_v44, 6 }
  0xa0   :  { %v121_v11 = vadd.f32 %v120_v9, %v119_v8  ;;  %v225_v63 = vsel %vm205_vm10, %v223_v52, %v224_v54 }
  0xa1   :  { %v222_v46 = vpop.permute.xlu1 %221 }
  0xa2   :  { %v140_v12 = vadd.f32 %v139_v10, %v121_v11  ;;  %v226_v53 = vrot.slane %v222_v46, 6 }
  0xa4   :  { %v141_v13 = vmul.f32 0.045454547, %v140_v12  ;;  %v227_v0 = vsel %vm205_vm10, %v224_v54, %v226_v53 }
  0xa6   :  { %v142_v15 = vsub.f32 %v113_v1, %v141_v13  ;;  %v143_v16 = vsub.f32 %v324_v14, %v141_v13  ;;  %v144_v17 = vsub.f32 %v330_v19, %v141_v13 }
  0xa8   :  { %v145_v18 = vmul.f32 %v142_v15, %v142_v15  ;;  %v153_v20 = vmul.f32 %v143_v16, %v143_v16  ;;  %v154_v21 = vmul.f32 %v144_v17, %v144_v17 }
  0xaa   :  { %v146_v22 = vsel %vm114_vm4, %v145_v18, 0.0  ;;  %v157_v23 = vrot.slane %v153_v20, 1  ;;  %v158_v24 = vrot.slane %v154_v21, 1 }
  0xab   :  { %v147_v25 = vrot.slane %v146_v22, 4 }
  0xac   :  { %v159_v26 = vsel %vm124_vm2, %v157_v23, %v158_v24  ;;  %v163_v27 = vsel %vm114_vm4, %v158_v24, 0.0 }
  0xad   :  { %v148_v28 = vadd.f32 %v147_v25, %v146_v22  ;;  %v162_v29 = vsel %vm130_vm5, %v159_v26, 0.0 }
  0xae   :  { %v164_v30 = vadd.f32 %v163_v27, %v162_v29 }
  0xaf   :  { %v149_v31 = vrot.slane %v148_v28, 2 }
  0xb0   :  { %v165_v14 = vrot.slane %v164_v30, 4 }
  0xb1   :  { %v150_v32 = vadd.f32 %v149_v31, %v148_v28 }
  0xb2   :  { %v166_v19 = vadd.f32 %v165_v14, %v164_v30 }
  0xb3   :  { %v151_v34 = vrot.slane %v150_v32, 1 }
  0xb4   :  { %v167_v33 = vrot.slane %v166_v19, 2 }
  0xb5   :  { %v152_v38 = vadd.f32 %v151_v34, %v150_v32 }
  0xb6   :  { %v168_v35 = vadd.f32 %v167_v33, %v166_v19 }
  0xb8   :  { %v169_v37 = vrot.slane %v168_v35, 1 }
  0xba   :  { %v170_v39 = vadd.f32 %v169_v37, %v168_v35 }
  0xbc   :  { %v171_v40 = vadd.f32 %v170_v39, %v152_v38 }
  0xbe   :  { %v172_v42 = vmul.f32 0.045454547, %v171_v40 }
  0xc0   :  { %v173_v43 = vadd.f32 1e-12, %v172_v42 }
  0xc2   :  { %265 = vrsqrt.f32 %v173_v43 }
  0xcc   :  { %v266_v51 = vpop.eup %265 }
  0xcd   :  { %v181_v55 = vmul.f32 %v266_v51, %v142_v15  ;;  %v195_v56 = vmul.f32 %v266_v51, %v143_v16  ;;  %v196_v57 = vmul.f32 %v266_v51, %v144_v17 }
  0xcf   :  { %v187_v60 = vmul.f32 %v185_v36, %v181_v55  ;;  %v213_v61 = vmul.f32 %v208_v58, %v195_v56  ;;  %v214_v62 = vmul.f32 %v210_v59, %v196_v57 }
  0xd1   :  { %v193_v1 = vadd.f32 %v191_v44, %v187_v60  ;;  %v230_v2 = vadd.f32 %v225_v63, %v213_v61  ;;  %v231_v3 = vadd.f32 %v227_v0, %v214_v62 }
  0xd3   :  { %194 = vst.msk [vmem:[%s363_s4] sm:$0x7f] %vm114_vm4, %v193_v1 }
  0xd4   :  { %233 = vst.msk [vmem:[%s363_s4 + $0x6] sm:$0xfe] %vm232_vm11, %v230_v2 }
  0xd5   :  { %234 = vst.msk [vmem:[%s363_s4 + $0xe] sm:$0xff] %vm130_vm5, %v231_v3 }

</bundles_post_ra>
